<compile_context>
chip_gen: v7x
topology: tpu7x:2x2x1
jax: 0.10.0
libtpu: 0.0.40
codegen_flags: <defaults>
</compile_context>

<pallas_src>
import jax
import jax.numpy as jnp
from jax.experimental import pallas as pl
from jax.experimental.pallas import tpu as pltpu

_LANE = 128
_MAX_TILE_ROWS = 2048  # 2048 * 128 * 4B = 1 MiB per f32 buffer


def _mix_u32(x):
    """Murmur3-finalizer-style 32-bit integer mix (good avalanche), pure jnp."""
    x = x ^ (x >> 16)
    x = x * jnp.uint32(0x7FEB352D)
    x = x ^ (x >> 15)
    x = x * jnp.uint32(0x846CA68B)
    x = x ^ (x >> 16)
    return x


def _uniform01(ctr_u32, seed_u32, salt):
    """Deterministic per-pixel uniform in [0, 1) from a counter + per-image seed."""
    h = _mix_u32((ctr_u32 ^ seed_u32) + jnp.uint32(salt))
    # Top 23 bits -> exact float32 in [0, 1).
    return (h >> 9).astype(jnp.int32).astype(jnp.float32) * jnp.float32(1.0 / 8388608.0)


def _augment_kernel(seed_ref, bright_ref, contrast_ref, nstd_ref, img_ref, out_ref):
    """Elementwise brightness / contrast / gaussian-noise for one image row-tile.

    seed_ref/bright_ref/contrast_ref/nstd_ref : SMEM (N,) scalar-prefetch arrays
    img_ref / out_ref : VMEM (1, tile_rows, cols), image's native dtype
    """
    b = pl.program_id(0)          # image index
    t = pl.program_id(1)          # row-tile index within the image

    bright = bright_ref[b]
    contrast = contrast_ref[b]
    nstd = nstd_ref[b]

    x = img_ref[0].astype(jnp.float32)            # (tile_rows, cols), f32 in-register
    tile_rows, cols = x.shape
    # Brightness / contrast surrogate (affine map).
    # TODO(synk): albumentations RandomContrast re-centers around the image mean;
    # this affine surrogate does not.
    y = x * contrast + bright

    @pl.when(nstd > 0.0)
    def _noisy():
        seed_u32 = seed_ref[b].astype(jnp.uint32)
        r = jax.lax.broadcasted_iota(jnp.int32, (tile_rows, cols), 0)
        c = jax.lax.broadcasted_iota(jnp.int32, (tile_rows, cols), 1)
        gflat = (t * tile_rows + r) * cols + c    # global per-image pixel counter
        ctr = gflat.astype(jnp.uint32)
        u0 = _uniform01(ctr, seed_u32, 0x9E3779B9)
        u1 = _uniform01(ctr, seed_u32, 0x3C6EF372)
        u2 = _uniform01(ctr, seed_u32, 0xDAA66D2B)
        u3 = _uniform01(ctr, seed_u32, 0x78DDE6E4)
        # Central-limit approximation of N(0, 1): (sum of 4 U(0,1) - 2) * sqrt(3).
        z = (u0 + u1 + u2 + u3 - 2.0) * 1.7320508
        out_ref[0] = (y + z * nstd).astype(out_ref.dtype)

    @pl.when(nstd <= 0.0)
    def _clean():
        out_ref[0] = y.astype(out_ref.dtype)


def _run_pallas_augment(images2d, seeds, bright, contrast, nstd):
    """images2d: (N, rows, cols) native dtype -> same shape/dtype, augmented."""
    n, rows, cols = images2d.shape
    tile_rows = rows if rows <= _MAX_TILE_ROWS else _MAX_TILE_ROWS
    grid = (n, pl.cdiv(rows, tile_rows))
    block = (1, tile_rows, cols)

    def idx(i, j, *prefetch):     # scalar-prefetch refs arrive positionally
        return (i, j, 0)

    nbytes = int(n) * int(rows) * int(cols) * int(images2d.dtype.itemsize)
    cost = pl.CostEstimate(
        flops=int(10 * n * rows * cols),   # FMA + noise hash; tiny vs. bytes
        transcendentals=0,
        bytes_accessed=2 * nbytes,
    )

    grid_spec = pltpu.PrefetchScalarGridSpec(
        num_scalar_prefetch=4,
        grid=grid,
        in_specs=[pl.BlockSpec(block, idx)],
        out_specs=pl.BlockSpec(block, idx),
    )
    return pl.pallas_call(
        _augment_kernel,
        out_shape=jax.ShapeDtypeStruct((n, rows, cols), images2d.dtype),
        grid_spec=grid_spec,
        compiler_params=pltpu.CompilerParams(
            dimension_semantics=("parallel", "parallel")),
        cost_estimate=cost,
    )(seeds, bright, contrast, nstd, images2d)


class AugmentPipe:
    """JAX/Pallas port of the PyTorch AugmentPipe forward pass."""

    def __init__(self, init_p=0.0, xflip=0, brightness=0, contrast=0, noise=0,
                 brightness_std=0.025, contrast_std=0.025, noise_std=0.05,
                 **unused_kwargs):
        self.p = float(init_p)
        self.xflip = float(xflip)
        self.brightness = float(brightness)
        self.contrast = float(contrast)
        self.noise = float(noise)
        self.brightness_std = float(brightness_std)
        self.contrast_std = float(contrast_std)
        self.noise_std = float(noise_std)

    def update_p(self, p):
        self.p = float(p)

    def forward(self, images, masks=None, debug=False, args=None, key=None):
        if debug:
            self.p = 0.5            # same side effect as the reference module
        if self.p == 0.0:
            return images, masks

        assert images.ndim == 4
        n, c, h, w = images.shape
        if key is None:
            key = jax.random.PRNGKey(0)

        k_flip, k_b, k_c, k_n, k_seed, k_pb, k_pc, k_pn = jax.random.split(key, 8)
        p = self.p

        # Per-image "does this transform fire" decisions (surrogate of A.SomeOf).
        flip_on = (jax.random.uniform(k_flip, (n,)) < p) & (self.xflip > 0)
        b_apply = ((jax.random.uniform(k_pb, (n,)) < p) & (self.brightness > 0)).astype(jnp.float32)
        c_apply = ((jax.random.uniform(k_pc, (n,)) < p) & (self.contrast > 0)).astype(jnp.float32)
        n_apply = ((jax.random.uniform(k_pn, (n,)) < p) & (self.noise > 0)).astype(jnp.float32)

        bright = (b_apply * jax.random.uniform(
            k_b, (n,), minval=-self.brightness_std, maxval=self.brightness_std)
        ).astype(jnp.float32)
        contrast = (1.0 + c_apply * jax.random.uniform(
            k_c, (n,), minval=-self.contrast_std, maxval=self.contrast_std)
        ).astype(jnp.float32)
        # A.GaussNoise(var_limit=(0, noise_std)): std = sqrt(U(0, noise_std)).
        nstd = (n_apply * jnp.sqrt(jax.random.uniform(
            k_n, (n,), minval=0.0, maxval=self.noise_std))).astype(jnp.float32)
        seeds = jax.random.randint(k_seed, (n,), 0, 2**31 - 1, dtype=jnp.int32)

        # Horizontal flip as a cheap fused XLA rev+select in the wrapper so the
        # Pallas kernel stays purely elementwise on a lane-dense layout.
        flipped = jnp.where(flip_on[:, None, None, None], images[..., ::-1], images)

        # Lane-dense slab: fold C*H*W into (rows, 128) when possible so kernel
        # stores are full-lane; otherwise fall back to (C*H, W).
        pixels = c * h * w
        cols = _LANE if pixels % _LANE == 0 else w
        rows = pixels // cols
        img2 = flipped.reshape(n, rows, cols)

        out2 = _run_pallas_augment(img2, seeds, bright, contrast, nstd)
        out = out2.reshape(n, c, h, w)
        return out, masks

    __call__ = forward


if __name__ == "__main__":
    key = jax.random.PRNGKey(0)
    k_img, k_mask, k_aug = jax.random.split(key, 3)

    N, C, H, W = 2, 4, 16, 16
    images = jax.random.uniform(k_img, (N, C, H, W), dtype=jnp.float32)
    masks = jax.random.uniform(k_mask, (N, 1, H, W), dtype=jnp.float32)

    # p == 0 path: identity.
    pipe0 = AugmentPipe(init_p=0.0, xflip=1, brightness=1, contrast=1, noise=1)
    out0, m0 = pipe0(images, masks)
    assert out0 is images and m0 is masks

    # p > 0 path: augmentation through the Pallas kernel.
    pipe = AugmentPipe(init_p=0.5, xflip=1, brightness=1, contrast=1, noise=1)
    out, m = pipe(images, masks, key=k_aug)
    out = jax.block_until_ready(out)
    assert out.shape == images.shape and out.dtype == images.dtype
    assert bool(jnp.all(jnp.isfinite(out)))
    print("KERNEL_OK")
</pallas_src>

<mosaic_0001>
module attributes {stable_mosaic.version = 11 : i64} {
  func.func @_augment_kernel(%arg0: i32, %arg1: i32, %arg2: memref<2xi32, #tpu.memory_space<smem>>, %arg3: memref<2xf32, #tpu.memory_space<smem>>, %arg4: memref<2xf32, #tpu.memory_space<smem>>, %arg5: memref<2xf32, #tpu.memory_space<smem>>, %arg6: memref<1x8x128xf32, #tpu.memory_space<vmem>>, %arg7: memref<1x8x128xf32, #tpu.memory_space<vmem>>) attributes {dimension_semantics = [#tpu.dimension_semantics<parallel>, #tpu.dimension_semantics<parallel>], iteration_bounds = array<i64: 2, 1>, scalar_prefetch = 4 : i64, scratch_operands = 0 : i64, tpu.core_type = #tpu.core_type<tc>, window_params = [{transform_indices = @transform_0, window_bounds = array<i64: 1, 8, 128>}, {transform_indices = @transform_1, window_bounds = array<i64: 1, 8, 128>}]} {
    %0 = arith.index_cast %arg0 : i32 to index
    %1 = memref.load %arg3[%0] : memref<2xf32, #tpu.memory_space<smem>>
    %2 = arith.index_cast %arg0 : i32 to index
    %3 = memref.load %arg4[%2] : memref<2xf32, #tpu.memory_space<smem>>
    %4 = arith.index_cast %arg0 : i32 to index
    %5 = memref.load %arg5[%4] : memref<2xf32, #tpu.memory_space<smem>>
    %c0 = arith.constant 0 : index
    %c0_0 = arith.constant 0 : index
    %c0_1 = arith.constant 0 : index
    %6 = vector.load %arg6[%c0, %c0_0, %c0_1] : memref<1x8x128xf32, #tpu.memory_space<vmem>>, vector<1x8x128xf32>
    %7 = vector.shape_cast %6 : vector<1x8x128xf32> to vector<8x128xf32>
    %8 = vector.broadcast %3 : f32 to vector<8x128xf32>
    %9 = arith.mulf %7, %8 : vector<8x128xf32>
    %10 = vector.broadcast %1 : f32 to vector<8x128xf32>
    %11 = arith.addf %9, %10 : vector<8x128xf32>
    %cst = arith.constant 0.000000e+00 : f32
    %12 = arith.cmpf ogt, %5, %cst : f32
    %13 = arith.extui %12 : i1 to i32
    %c0_i32 = arith.constant 0 : i32
    %14 = arith.cmpi ne, %13, %c0_i32 : i32
    scf.if %14 {
      %18 = arith.index_cast %arg0 : i32 to index
      %19 = memref.load %arg2[%18] : memref<2xi32, #tpu.memory_space<smem>>
      %20 = tpu.iota {dimensions = array<i32: 0>} : vector<8x128xi32>
      %21 = tpu.iota {dimensions = array<i32: 1>} : vector<8x128xi32>
      %c8_i32 = arith.constant 8 : i32
      %22 = arith.muli %arg1, %c8_i32 : i32
      %23 = vector.broadcast %22 : i32 to vector<8x128xi32>
      %24 = arith.addi %23, %20 : vector<8x128xi32>
      %c128_i32 = arith.constant 128 : i32
      %25 = vector.broadcast %c128_i32 : i32 to vector<8x128xi32>
      %26 = arith.muli %24, %25 : vector<8x128xi32>
      %27 = arith.addi %26, %21 : vector<8x128xi32>
      %28 = vector.broadcast %19 : i32 to vector<8x128xi32>
      %29 = arith.xori %27, %28 : vector<8x128xi32>
      %c-1640531527_i32 = arith.constant -1640531527 : i32
      %30 = vector.broadcast %c-1640531527_i32 : i32 to vector<8x128xi32>
      %31 = arith.addi %29, %30 : vector<8x128xi32>
      %c16_i32 = arith.constant 16 : i32
      %32 = vector.broadcast %c16_i32 : i32 to vector<8x128xi32>
      %33 = arith.shrui %31, %32 : vector<8x128xi32>
      %34 = arith.xori %31, %33 : vector<8x128xi32>
      %c2146121005_i32 = arith.constant 2146121005 : i32
      %35 = vector.broadcast %c2146121005_i32 : i32 to vector<8x128xi32>
      %36 = arith.muli %34, %35 : vector<8x128xi32>
      %c15_i32 = arith.constant 15 : i32
      %37 = vector.broadcast %c15_i32 : i32 to vector<8x128xi32>
      %38 = arith.shrui %36, %37 : vector<8x128xi32>
      %39 = arith.xori %36, %38 : vector<8x128xi32>
      %c-2073254261_i32 = arith.constant -2073254261 : i32
      %40 = vector.broadcast %c-2073254261_i32 : i32 to vector<8x128xi32>
      %41 = arith.muli %39, %40 : vector<8x128xi32>
      %c16_i32_4 = arith.constant 16 : i32
      %42 = vector.broadcast %c16_i32_4 : i32 to vector<8x128xi32>
      %43 = arith.shrui %41, %42 : vector<8x128xi32>
      %44 = arith.xori %41, %43 : vector<8x128xi32>
      %c9_i32 = arith.constant 9 : i32
      %45 = vector.broadcast %c9_i32 : i32 to vector<8x128xi32>
      %46 = arith.shrui %44, %45 : vector<8x128xi32>
      %47 = arith.sitofp %46 : vector<8x128xi32> to vector<8x128xf32>
      %cst_5 = arith.constant 1.1920929E-7 : f32
      %48 = vector.broadcast %cst_5 : f32 to vector<8x128xf32>
      %49 = arith.mulf %47, %48 : vector<8x128xf32>
      %50 = vector.broadcast %19 : i32 to vector<8x128xi32>
      %51 = arith.xori %27, %50 : vector<8x128xi32>
      %c1013904242_i32 = arith.constant 1013904242 : i32
      %52 = vector.broadcast %c1013904242_i32 : i32 to vector<8x128xi32>
      %53 = arith.addi %51, %52 : vector<8x128xi32>
      %c16_i32_6 = arith.constant 16 : i32
      %54 = vector.broadcast %c16_i32_6 : i32 to vector<8x128xi32>
      %55 = arith.shrui %53, %54 : vector<8x128xi32>
      %56 = arith.xori %53, %55 : vector<8x128xi32>
      %c2146121005_i32_7 = arith.constant 2146121005 : i32
      %57 = vector.broadcast %c2146121005_i32_7 : i32 to vector<8x128xi32>
      %58 = arith.muli %56, %57 : vector<8x128xi32>
      %c15_i32_8 = arith.constant 15 : i32
      %59 = vector.broadcast %c15_i32_8 : i32 to vector<8x128xi32>
      %60 = arith.shrui %58, %59 : vector<8x128xi32>
      %61 = arith.xori %58, %60 : vector<8x128xi32>
      %c-2073254261_i32_9 = arith.constant -2073254261 : i32
      %62 = vector.broadcast %c-2073254261_i32_9 : i32 to vector<8x128xi32>
      %63 = arith.muli %61, %62 : vector<8x128xi32>
      %c16_i32_10 = arith.constant 16 : i32
      %64 = vector.broadcast %c16_i32_10 : i32 to vector<8x128xi32>
      %65 = arith.shrui %63, %64 : vector<8x128xi32>
      %66 = arith.xori %63, %65 : vector<8x128xi32>
      %c9_i32_11 = arith.constant 9 : i32
      %67 = vector.broadcast %c9_i32_11 : i32 to vector<8x128xi32>
      %68 = arith.shrui %66, %67 : vector<8x128xi32>
      %69 = arith.sitofp %68 : vector<8x128xi32> to vector<8x128xf32>
      %cst_12 = arith.constant 1.1920929E-7 : f32
      %70 = vector.broadcast %cst_12 : f32 to vector<8x128xf32>
      %71 = arith.mulf %69, %70 : vector<8x128xf32>
      %72 = vector.broadcast %19 : i32 to vector<8x128xi32>
      %73 = arith.xori %27, %72 : vector<8x128xi32>
      %c-626627285_i32 = arith.constant -626627285 : i32
      %74 = vector.broadcast %c-626627285_i32 : i32 to vector<8x128xi32>
      %75 = arith.addi %73, %74 : vector<8x128xi32>
      %c16_i32_13 = arith.constant 16 : i32
      %76 = vector.broadcast %c16_i32_13 : i32 to vector<8x128xi32>
      %77 = arith.shrui %75, %76 : vector<8x128xi32>
      %78 = arith.xori %75, %77 : vector<8x128xi32>
      %c2146121005_i32_14 = arith.constant 2146121005 : i32
      %79 = vector.broadcast %c2146121005_i32_14 : i32 to vector<8x128xi32>
      %80 = arith.muli %78, %79 : vector<8x128xi32>
      %c15_i32_15 = arith.constant 15 : i32
      %81 = vector.broadcast %c15_i32_15 : i32 to vector<8x128xi32>
      %82 = arith.shrui %80, %81 : vector<8x128xi32>
      %83 = arith.xori %80, %82 : vector<8x128xi32>
      %c-2073254261_i32_16 = arith.constant -2073254261 : i32
      %84 = vector.broadcast %c-2073254261_i32_16 : i32 to vector<8x128xi32>
      %85 = arith.muli %83, %84 : vector<8x128xi32>
      %c16_i32_17 = arith.constant 16 : i32
      %86 = vector.broadcast %c16_i32_17 : i32 to vector<8x128xi32>
      %87 = arith.shrui %85, %86 : vector<8x128xi32>
      %88 = arith.xori %85, %87 : vector<8x128xi32>
      %c9_i32_18 = arith.constant 9 : i32
      %89 = vector.broadcast %c9_i32_18 : i32 to vector<8x128xi32>
      %90 = arith.shrui %88, %89 : vector<8x128xi32>
      %91 = arith.sitofp %90 : vector<8x128xi32> to vector<8x128xf32>
      %cst_19 = arith.constant 1.1920929E-7 : f32
      %92 = vector.broadcast %cst_19 : f32 to vector<8x128xf32>
      %93 = arith.mulf %91, %92 : vector<8x128xf32>
      %94 = vector.broadcast %19 : i32 to vector<8x128xi32>
      %95 = arith.xori %27, %94 : vector<8x128xi32>
      %c2027808484_i32 = arith.constant 2027808484 : i32
      %96 = vector.broadcast %c2027808484_i32 : i32 to vector<8x128xi32>
      %97 = arith.addi %95, %96 : vector<8x128xi32>
      %c16_i32_20 = arith.constant 16 : i32
      %98 = vector.broadcast %c16_i32_20 : i32 to vector<8x128xi32>
      %99 = arith.shrui %97, %98 : vector<8x128xi32>
      %100 = arith.xori %97, %99 : vector<8x128xi32>
      %c2146121005_i32_21 = arith.constant 2146121005 : i32
      %101 = vector.broadcast %c2146121005_i32_21 : i32 to vector<8x128xi32>
      %102 = arith.muli %100, %101 : vector<8x128xi32>
      %c15_i32_22 = arith.constant 15 : i32
      %103 = vector.broadcast %c15_i32_22 : i32 to vector<8x128xi32>
      %104 = arith.shrui %102, %103 : vector<8x128xi32>
      %105 = arith.xori %102, %104 : vector<8x128xi32>
      %c-2073254261_i32_23 = arith.constant -2073254261 : i32
      %106 = vector.broadcast %c-2073254261_i32_23 : i32 to vector<8x128xi32>
      %107 = arith.muli %105, %106 : vector<8x128xi32>
      %c16_i32_24 = arith.constant 16 : i32
      %108 = vector.broadcast %c16_i32_24 : i32 to vector<8x128xi32>
      %109 = arith.shrui %107, %108 : vector<8x128xi32>
      %110 = arith.xori %107, %109 : vector<8x128xi32>
      %c9_i32_25 = arith.constant 9 : i32
      %111 = vector.broadcast %c9_i32_25 : i32 to vector<8x128xi32>
      %112 = arith.shrui %110, %111 : vector<8x128xi32>
      %113 = arith.sitofp %112 : vector<8x128xi32> to vector<8x128xf32>
      %cst_26 = arith.constant 1.1920929E-7 : f32
      %114 = vector.broadcast %cst_26 : f32 to vector<8x128xf32>
      %115 = arith.mulf %113, %114 : vector<8x128xf32>
      %116 = arith.addf %49, %71 : vector<8x128xf32>
      %117 = arith.addf %116, %93 : vector<8x128xf32>
      %118 = arith.addf %117, %115 : vector<8x128xf32>
      %cst_27 = arith.constant 2.000000e+00 : f32
      %119 = vector.broadcast %cst_27 : f32 to vector<8x128xf32>
      %120 = arith.subf %118, %119 : vector<8x128xf32>
      %cst_28 = arith.constant 1.73205078 : f32
      %121 = vector.broadcast %cst_28 : f32 to vector<8x128xf32>
      %122 = arith.mulf %120, %121 : vector<8x128xf32>
      %123 = vector.broadcast %5 : f32 to vector<8x128xf32>
      %124 = arith.mulf %122, %123 : vector<8x128xf32>
      %125 = arith.addf %11, %124 : vector<8x128xf32>
      %c0_29 = arith.constant 0 : index
      %c0_30 = arith.constant 0 : index
      %c0_31 = arith.constant 0 : index
      %126 = vector.load %arg7[%c0_29, %c0_30, %c0_31] : memref<1x8x128xf32, #tpu.memory_space<vmem>>, vector<1x8x128xf32>
      %127 = vector.shape_cast %126 : vector<1x8x128xf32> to vector<8x128xf32>
      %128 = vector.shape_cast %125 : vector<8x128xf32> to vector<1x8x128xf32>
      tpu.vector_store %arg7[%c0_29, %c0_30, %c0_31], %128 {strides = array<i32>} : memref<1x8x128xf32, #tpu.memory_space<vmem>>, vector<1x8x128xf32>,
    } else {
    }
    %cst_2 = arith.constant 0.000000e+00 : f32
    %15 = arith.cmpf ole, %5, %cst_2 : f32
    %16 = arith.extui %15 : i1 to i32
    %c0_i32_3 = arith.constant 0 : i32
    %17 = arith.cmpi ne, %16, %c0_i32_3 : i32
    scf.if %17 {
      %c0_4 = arith.constant 0 : index
      %c0_5 = arith.constant 0 : index
      %c0_6 = arith.constant 0 : index
      %18 = vector.load %arg7[%c0_4, %c0_5, %c0_6] : memref<1x8x128xf32, #tpu.memory_space<vmem>>, vector<1x8x128xf32>
      %19 = vector.shape_cast %18 : vector<1x8x128xf32> to vector<8x128xf32>
      %20 = vector.shape_cast %11 : vector<8x128xf32> to vector<1x8x128xf32>
      tpu.vector_store %arg7[%c0_4, %c0_5, %c0_6], %20 {strides = array<i32>} : memref<1x8x128xf32, #tpu.memory_space<vmem>>, vector<1x8x128xf32>,
    } else {
    }
    return
  }
  func.func @transform_0(%arg0: i32, %arg1: i32, %arg2: memref<2xi32, #tpu.memory_space<smem>>, %arg3: memref<2xf32, #tpu.memory_space<smem>>, %arg4: memref<2xf32, #tpu.memory_space<smem>>, %arg5: memref<2xf32, #tpu.memory_space<smem>>) -> (i32, i32, i32) {
    %c0_i32 = arith.constant 0 : i32
    %c0_i32_0 = arith.constant 0 : i32
    return %arg0, %arg1, %c0_i32 : i32, i32, i32
  }
  func.func @transform_1(%arg0: i32, %arg1: i32, %arg2: memref<2xi32, #tpu.memory_space<smem>>, %arg3: memref<2xf32, #tpu.memory_space<smem>>, %arg4: memref<2xf32, #tpu.memory_space<smem>>, %arg5: memref<2xf32, #tpu.memory_space<smem>>) -> (i32, i32, i32) {
    %c0_i32 = arith.constant 0 : i32
    %c0_i32_0 = arith.constant 0 : i32
    return %arg0, %arg1, %c0_i32 : i32, i32, i32
  }
}

</mosaic_0001>

<bundles_post_ra>
// kernel: tpu_custom_call.1
= control target key start
LH: loop header
LB: loop body
LE: loop exit
PB: predicated region body
PF: predicated region fallthrough
CT: control target
= control target key end

     0   :  { %s833_s0 = inlined_call_operand.hbm [shape: s32[2], index: 0, kind: input, shape index: {}]   ;;  %s834_s4 = inlined_call_operand.hbm [shape: f32[2,8,128], index: 4, kind: input, shape index: {}]   ;;  %s835_s5 = inlined_call_operand.hbm [shape: f32[2,8,128], index: 5, kind: output, shape index: {}]   ;;  %s836_s1 = inlined_call_operand.vmem [shape: f32[2], index: 1, kind: input, shape index: {}]   ;;  %s837_s2 = inlined_call_operand.vmem [shape: f32[2], index: 2, kind: input, shape index: {}]   ;;  %s838_s3 = inlined_call_operand.vmem [shape: f32[2], index: 3, kind: input, shape index: {}]  }
   0x1   :  { %s430_s20 = scalar_lea.hbm %s833_s0, 16 }
   0x2   :  { %p431_p0 = scmp.ne.s32.totalorder %s833_s0, %s430_s20  ;;  %p434_p1 = scmp.lt.u32.totalorder %s430_s20, %s833_s0 }
   0x4   :  { %p436_p2 = pnand %p434_p1, %p431_p0 }
   0x6   :  { %439 = shalt.err (!%p436_p2)  }
   0x7   :  { %s592_s25 = smov [#allocation3]   ;;  %s12_s30 = sshll.u32 %s836_s1, 4  ;;  %s13_s30 = int_to_ptr.vmem [resolvable:$true] %s12_s30 }
   0x8   :  { %11 = dma.hbm_to_smem %s833_s0, 16, %s592_s25, [#allocation2] }
   0x9   :  { %s16_s8 = sshll.u32 %s837_s2, 4  ;;  %s440_s9 = scalar_lea.vmem %s13_s30, 16  ;;  %s17_s8 = int_to_ptr.vmem [resolvable:$true] %s16_s8 }
   0xa   :  { %p441_p3 = scmp.ne.s32.totalorder %s13_s30, %s440_s9  ;;  %p445_p4 = scmp.lt.s32.totalorder %s13_s30, %s13_s30 }
   0xb   :  { %p446_p5 = scmp.lt.s32.totalorder %s440_s9, %s440_s9 }
   0xd   :  { %p447_p6 = por %p446_p5, %p445_p4 }
   0xf   :  { %p448_p7 = pnand %p447_p6, %p441_p3 }
  0x11   :  { %451 = shalt.err (!%p448_p7)  }
  0x12   :  { %s593_s10 = smov [#allocation4]   ;;  %s20_s12 = sshll.u32 %s838_s3, 4  ;;  %s21_s12 = int_to_ptr.vmem [resolvable:$true] %s20_s12 }
  0x13   :  { %15 = dma.vmem_to_smem %s13_s30, 16, %s593_s10, [#allocation2] }
  0x14   :  { %s452_s1 = scalar_lea.vmem %s17_s8, 16  ;;  %p457_p9 = scmp.lt.s32.totalorder %s17_s8, %s17_s8 }
  0x15   :  { %p453_p8 = scmp.ne.s32.totalorder %s17_s8, %s452_s1  ;;  %p458_p10 = scmp.lt.s32.totalorder %s452_s1, %s452_s1 }
  0x17   :  { %p459_p11 = por %p458_p10, %p457_p9 }
  0x19   :  { %p460_p12 = pnand %p459_p11, %p453_p8 }
  0x1b   :  { %463 = shalt.err (!%p460_p12)  }
  0x1c   :  { %s594_s2 = smov [#allocation5]   ;;  %s464_s13 = scalar_lea.vmem %s21_s12, 16 }
  0x1d   :  { %19 = dma.vmem_to_smem %s17_s8, 16, %s594_s2, [#allocation2] }
  0x1e   :  { %p465_p13 = scmp.ne.s32.totalorder %s21_s12, %s464_s13  ;;  %p469_p0 = scmp.lt.s32.totalorder %s21_s12, %s21_s12 }
  0x1f   :  { %p470_p1 = scmp.lt.s32.totalorder %s464_s13, %s464_s13 }
  0x21   :  { %p471_p2 = por %p470_p1, %p469_p0 }
  0x23   :  { %p472_p3 = pnand %p471_p2, %p465_p13 }
  0x25   :  { %475 = shalt.err (!%p472_p3)  }
  0x26   :  { %s595_s14 = smov [#allocation6]  }
  0x27   :  { %23 = dma.vmem_to_smem %s21_s12, 16, %s595_s14, [#allocation2] }
  0x28   :  { %558 = dma.done.wait [#allocation2], 64 }
  0x29   :  { %559 = vsyncadd [#allocation2], 4294967232 }
  0x2a   :  { %25 = sfence }
  0x2b   :  { %26 = vsyncpa [#allocation8], 0 }
  0x2c   :  { %28 = vsyncpa [#allocation8 + $0x1], 0 }
  0x2d   :  { %29 = vsyncpa [#allocation9], 0 }
  0x2e   :  { %31 = vsyncpa [#allocation9 + $0x1], 0  ;;  %s649_s3 = smov 0   ;;  %s651_s15 = smov 0  }
  0x2f   :  { %s653_s16 = smov 0   ;;  %s655_s17 = smov 0  }
  0x30   :  { %s657_s18 = smov 0   ;;  %s659_s19 = smov 0  }
  0x31 LB: > { %s350_s20 = sadd.s32 4294967295, %s590_s19   ;;  %s351_s21 = sadd.s32 4294967294, %s590_s19   ;;  %s590_s19 = sphi %s659_s19, %s37_s19   ;;  %s586_s18 = sphi %s657_s18, %s854_s18   ;;  %s582_s17 = sphi %s655_s17, %s853_s17   ;;  %s578_s16 = sphi %s653_s16, %s852_s16   ;;  %s574_s15 = sphi %s651_s15, %s851_s15   ;;  %s570_s3 = sphi %s649_s3, %s850_s3  }
  0x32   : > { %s49_s22 = sadd.s32 1, %s586_s18  ;;  %s58_s23 = sadd.s32 1, %s578_s16 }
  0x33   : > { %p51_p4 = scmp.ge.s32.totalorder %s49_s22, 2  ;;  %p65_p5 = scmp.ne.s32.totalorder %s578_s16, %s574_s15 }
  0x34   : > { %p66_p6 = scmp.eq.s32.totalorder %s590_s19, 0  ;;  %p71_p7 = scmp.ne.s32.totalorder %s574_s15, %s570_s3 }
  0x35   : > { %s856_s22 = smov (%p51_p4, %s49_s22), 0  ;;  %p72_p9 = scmp.eq.s32.totalorder %s350_s20, 0 }
  0x36   : > { %p690_p8 = por %p66_p6, %p65_p5  ;;  %s53_s25 = ssub.s32 %s586_s18, %s856_s22 }
  0x37   : > { %p97_p10 = scmp.eq.s32.totalorder %s350_s20, 1  ;;  %p56_p11 = scmp.eq.s32.totalorder %s53_s25, 0 }
  0x38   : > { %p696_p12 = por %p72_p9, %p71_p7  ;;  %p103_p0 = scmp.eq.s32.totalorder %s351_s21, 1 }
  0x39   : > { %p700_p13 = por %p97_p10, %p65_p5  ;;  %p376_p3 = scmp.lt.s32.totalorder %s590_s19, 2 }
  0x3a   : > { %s705_s28 = scalar_select %p56_p11, %s578_s16, %s58_s23  }
  0x3b   : > { %s842_s27 = scalar_select %p700_p13, 1, 0 }
  0x3c   : > { %p707_p1 = por %p103_p0, %p71_p7  ;;  %s123_s30 = sand.u32 1, %s578_s16  }
  0x3d   : > { %s354_s6 = sshll.u32 %s123_s30, 3  ;;  %s355_s7 = sshll.u32 %s586_s18, 7 }
  0x3e   : > { %s843_s29 = scalar_select %p707_p1, 1, 0 }
  0x3f   : > { %s718_s10 = scalar_lea.hbm %s834_s4, %s355_s7  ;;  %s127_s0 = scalar_lea.vmem [#allocation7], %s354_s6 }
  0x40   : > { %s135_s11 = sshll.u32 %s127_s0, 4  ;;  %p724_p4 = pnand %p376_p3, %p690_p8  ;;  %s720_s11 = int_to_ptr.vmem [resolvable:$true] %s135_s11 }
  0x41   : > { %s124_s1 = scalar_lea.sflag [#allocation8], %s123_s30  ;;  %s476_s2 = scalar_lea.hbm %s718_s10, 128 }
  0x42   : > { %p477_p7 = scmp.ne.s32.totalorder %s718_s10, %s476_s2  ;;  %p478_p9 = pneg %p724_p4 }
  0x43   : > { %s481_s20 = scalar_lea.hbm %s834_s4, 256  ;;  %p482_p8 = scmp.lt.u32.totalorder %s718_s10, %s834_s4 }
  0x44   : > { %p479_p10 = pnand %p478_p9, %p477_p7  ;;  %p483_p0 = scmp.lt.u32.totalorder %s481_s20, %s476_s2 }
  0x45   : > { %p485_p2 = scmp.lt.u32.totalorder %s476_s2, %s718_s10 }
  0x46   : > { %p480_p11 = pneg %p479_p10  ;;  %p484_p3 = por %p483_p0, %p482_p8 }
  0x48   : > { %p486_p5 = por %p485_p2, %p484_p3 }
  0x4a   : > { %p487_p6 = pnand %p486_p5, %p480_p11 }
  0x4c   : > { %490 = shalt.err (!%p487_p6)
}
  0x4d   : > { %s491_s24 = scalar_lea.vmem %s720_s11, 128  ;;  %s596_s25 = smov [#allocation7]  }
  0x4e   : > { %p492_p7 = scmp.ne.s32.totalorder %s720_s11, %s491_s24  ;;  %s496_s30 = sshll.u32 %s596_s25, 4  ;;  %s497_s30 = int_to_ptr.vmem [resolvable:$false] %s496_s30 }
  0x4f   : > { %s498_s6 = scalar_lea.vmem %s497_s30, 256  ;;  %p499_p13 = scmp.lt.s32.totalorder %s720_s11, %s497_s30 }
  0x50   : > { %p494_p10 = pnand %p492_p7, %p478_p9  ;;  %p500_p8 = scmp.lt.s32.totalorder %s498_s6, %s491_s24 }
  0x52   : > { %p495_p1 = pneg %p494_p10  ;;  %p501_p0 = por %p500_p8, %p499_p13 }
  0x54   : > { %p502_p2 = pnand %p501_p0, %p495_p1 }
  0x56   : > { %505 = shalt.err (!%p502_p2)
}
  0x57   : > { %371 = dma.hbm_to_vmem [thread:$0]  (!%p724_p4), %s718_s10, 128, %s720_s11, %s124_s1  }
  0x58   : > { %p845_p5 = scmp.lt.s32.totalorder %s590_s19, 3  ;;  %p846_p6 = scmp.ge.s32.totalorder %s590_s19, 1 }
  0x5a   : > { %p141_p9 = pnand %p846_p6, %p845_p5 }
  0x5b   : > { %s760_s7 = sand.u32 (!%p141_p9), 1, %s574_s15  }
  0x5c   : > { %144 = sbr.rel (%p141_p9) target bundleno = 192 (0xc0), region = 24  ;;  %s357_s8 = sshll.u32 (!%p141_p9), %s760_s7, 3 }
  0x5d   : > { %s147_s9 = scalar_lea.sflag (!%p141_p9), [#allocation8], %s760_s7  ;;  %s150_s0 = scalar_lea.vmem (!%p141_p9), [#allocation7], %s357_s8 }
  0x63   : > { %561 = dma.done.wait (%p696_p12), %s147_s9, 128  }
  0x64   : > { %563 = vsyncadd (%p696_p12), %s147_s9, 4294967168  ;;  %s169_s10 = sld [smem:[#allocation4 + %s582_s17]]  ;;  %v172_v0 = vld [vmem:[%s150_s0] sm:$0xff]  ;;  %s776_s1 = scalar_lea.vmem [#allocation10], %s357_s8 }
  0x65   : > { %s170_s11 = sld [smem:[#allocation5 + %s582_s17]] }
  0x66   : > { %s771_s12 = sld [smem:[#allocation6 + %s582_s17]] }
  0x6a   : > { %v175_v2 = vstv %s169_s10 }
  0x6b   : > { %v173_v1 = vstv %s170_s11 }
  0x6c   : > { %v174_v3 = vmul.f32 %v173_v1, %v172_v0  ;;  %p177_p13 = scmp.gt.f32.partialorder %s771_s12, 0.0 }
  0x6d   : > { %s181_s26 = sld [smem:[#allocation3 + %s582_s17]] (%p177_p13)  ;;  %v182_v5 = vlaneseq (%p177_p13)  ;;  %v246_v0 = vstv (%p177_p13), %s771_s12 }
  0x6e   : > { %v774_v4 = vadd.f32 %v175_v2, %v174_v3  ;;  %180 = sbr.rel (!%p177_p13) target bundleno = 158 (0x9e), region = 32 }
  0x6f   : > { %v183_v6 = vshrl.u32 (%p177_p13), %v182_v5, 7  ;;  %v185_v7 = vand.u32 (%p177_p13), 127, %v182_v5 }
  0x71   : > { %v189_v8 = vmul.u32 (%p177_p13), 128, %v183_v6 }
  0x73   : > { %v190_v9 = vadd.s32 (%p177_p13), %v189_v8, %v185_v7  ;;  %v191_v10 = vstv (%p177_p13), %s181_s26 }
  0x75   : > { %v192_v11 = vxor.u32 %v191_v10, %v190_v9 }
  0x77   : > { %v193_v12 = vadd.s32 2654435769, %v192_v11  ;;  %v205_v13 = vadd.s32 1013904242, %v192_v11  ;;  %v217_v14 = vadd.s32 3668340011, %v192_v11 }
  0x78   : > { %v229_v15 = vadd.s32 2027808484, %v192_v11 }
  0x79   : > { %v194_v16 = vshrl.u32 %v193_v12, 16  ;;  %v206_v17 = vshrl.u32 %v205_v13, 16  ;;  %v218_v18 = vshrl.u32 %v217_v14, 16 }
  0x7a   : > { %v230_v19 = vshrl.u32 %v229_v15, 16 }
  0x7b   : > { %v195_v20 = vxor.u32 %v194_v16, %v193_v12  ;;  %v207_v21 = vxor.u32 %v206_v17, %v205_v13  ;;  %v219_v22 = vxor.u32 %v218_v18, %v217_v14 }
  0x7c   : > { %v231_v23 = vxor.u32 %v230_v19, %v229_v15 }
  0x7d   : > { %v196_v24 = vmul.u32 2146121005, %v195_v20  ;;  %v208_v25 = vmul.u32 2146121005, %v207_v21 }
  0x7e   : > { %v220_v26 = vmul.u32 2146121005, %v219_v22  ;;  %v232_v27 = vmul.u32 2146121005, %v231_v23 }
  0x7f   : > { %v197_v28 = vshrl.u32 %v196_v24, 15  ;;  %v209_v29 = vshrl.u32 %v208_v25, 15 }
  0x80   : > { %v221_v30 = vshrl.u32 %v220_v26, 15  ;;  %v233_v31 = vshrl.u32 %v232_v27, 15 }
  0x81   : > { %v198_v32 = vxor.u32 %v197_v28, %v196_v24  ;;  %v210_v33 = vxor.u32 %v209_v29, %v208_v25 }
  0x82   : > { %v222_v34 = vxor.u32 %v221_v30, %v220_v26  ;;  %v234_v35 = vxor.u32 %v233_v31, %v232_v27 }
  0x83   : > { %v199_v36 = vmul.u32 2221713035, %v198_v32  ;;  %v211_v37 = vmul.u32 2221713035, %v210_v33 }
  0x84   : > { %v223_v38 = vmul.u32 2221713035, %v222_v34  ;;  %v235_v39 = vmul.u32 2221713035, %v234_v35 }
  0x85   : > { %v200_v40 = vshrl.u32 %v199_v36, 16  ;;  %v212_v41 = vshrl.u32 %v211_v37, 16 }
  0x86   : > { %v224_v42 = vshrl.u32 %v223_v38, 16  ;;  %v236_v43 = vshrl.u32 %v235_v39, 16 }
  0x87   : > { %v201_v44 = vxor.u32 %v200_v40, %v199_v36  ;;  %v213_v45 = vxor.u32 %v212_v41, %v211_v37 }
  0x88   : > { %v225_v46 = vxor.u32 %v224_v42, %v223_v38  ;;  %v237_v47 = vxor.u32 %v236_v43, %v235_v39 }
  0x89   : > { %v202_v48 = vshrl.u32 %v201_v44, 9  ;;  %v214_v49 = vshrl.u32 %v213_v45, 9 }
  0x8a   : > { %v226_v50 = vshrl.u32 %v225_v46, 9  ;;  %v238_v51 = vshrl.u32 %v237_v47, 9 }
  0x8b   : > { %v203_v52 = vcvt.s32.f32 %v202_v48  ;;  %v215_v53 = vcvt.s32.f32 %v214_v49 }
  0x8c   : > { %v227_v54 = vcvt.s32.f32 %v226_v50  ;;  %v239_v55 = vcvt.s32.f32 %v238_v51 }
  0x8d   : > { %v204_v56 = vmul.f32 1.1920929e-07, %v203_v52  ;;  %v216_v57 = vmul.f32 1.1920929e-07, %v215_v53 }
  0x8e   : > { %v228_v58 = vmul.f32 1.1920929e-07, %v227_v54  ;;  %v240_v59 = vmul.f32 1.1920929e-07, %v239_v55 }
  0x8f   : > { %v241_v60 = vadd.f32 %v216_v57, %v204_v56 }
  0x91   : > { %v242_v61 = vadd.f32 %v241_v60, %v228_v58 }
  0x93   : > { %v243_v62 = vadd.f32 %v242_v61, %v240_v59 }
  0x95   : > { %v359_v63 = vadd.f32 -2.0, %v243_v62 }
  0x97   : > { %v245_v1 = vmul.f32 1.7320508, %v359_v63 }
  0x99   : > { %v247_v2 = vmul.f32 %v246_v0, %v245_v1 }
  0x9b   : > { %v248_v3 = vadd.f32 %v247_v2, %v774_v4 }
  0x9d   : > { %249 = vst [vmem:[%s776_s1] sm:$0xff] %v248_v3 }
  0x9e PF: > { %p250_p12 = scmp.le.f32.partialorder %s771_s12, 0.0 }
  0x9f   : > { %254 = vst [vmem:[%s776_s1] sm:$0xff] (%p250_p12), %v774_v4 }
  0xa0   : > { %253 = sbr.rel (!%p250_p12) target bundleno = 167 (0xa7), region = 36 }
  0xa7 PF: > { %s361_s2 = sshll.u32 %s582_s17, 7  ;;  %s270_s21 = sshll.u32 %s776_s1, 4  ;;  %s271_s21 = int_to_ptr.vmem [resolvable:$true] %s270_s21 }
  0xa8   : > { %s789_s20 = scalar_lea.hbm %s835_s5, %s361_s2  ;;  %s256_s23 = scalar_lea.sflag [#allocation9], %s760_s7 }
  0xa9   : > { %s506_s24 = scalar_lea.vmem %s271_s21, 128  ;;  %p847_p4 = scmp.ne.s32.totalorder %s842_s27, 0 }
  0xaa   : > { %p507_p1 = scmp.ne.s32.totalorder %s271_s21, %s506_s24  ;;  %s597_s25 = smov [#allocation10]  }
  0xab   : > { %s510_s30 = sshll.u32 %s597_s25, 4  ;;  %s511_s30 = int_to_ptr.vmem [resolvable:$false] %s510_s30 }
  0xac   : > { %p508_p11 = pnand %p507_p1, %p847_p4  ;;  %s512_s6 = scalar_lea.vmem %s511_s30, 256 }
  0xad   : > { %p513_p7 = scmp.lt.s32.totalorder %s271_s21, %s511_s30  ;;  %p514_p10 = scmp.lt.s32.totalorder %s512_s6, %s506_s24 }
  0xae   : > { %p509_p3 = pneg %p508_p11 }
  0xaf   : > { %p515_p8 = por %p514_p10, %p513_p7 }
  0xb1   : > { %p516_p0 = pnand %p515_p8, %p509_p3 }
  0xb3   : > { %519 = shalt.err (!%p516_p0)
}
  0xb4   : > { %s520_s17 = scalar_lea.hbm %s789_s20, 128  ;;  %s524_s9 = scalar_lea.hbm %s835_s5, 256 }
  0xb5   : > { %p521_p2 = scmp.ne.s32.totalorder %s789_s20, %s520_s17  ;;  %p525_p9 = scmp.lt.u32.totalorder %s789_s20, %s835_s5 }
  0xb6   : > { %p526_p13 = scmp.lt.u32.totalorder %s524_s9, %s520_s17  ;;  %p528_p1 = scmp.lt.u32.totalorder %s520_s17, %s789_s20 }
  0xb7   : > { %p522_p5 = pnand %p521_p2, %p847_p4 }
  0xb8   : > { %p527_p12 = por %p526_p13, %p525_p9 }
  0xb9   : > { %p523_p6 = pneg %p522_p5 }
  0xba   : > { %p529_p11 = por %p528_p1, %p527_p12 }
  0xbc   : > { %p530_p3 = pnand %p529_p11, %p523_p6 }
  0xbe   : > { %533 = shalt.err (!%p530_p3)
}
  0xbf   : > { %366 = dma.vmem_to_hbm [thread:$0]  (%p847_p4), %s271_s21, 128, %s789_s20, %s256_s23  }
  0xc0 PF: > { %s282_s11 = sand.u32 1, %s570_s3   ;;  %p848_p7 = scmp.ne.s32.totalorder %s843_s29, 0 }
  0xc1   : > { %p849_p10 = scmp.ge.s32.totalorder %s590_s19, 2  ;;  %s283_s12 = scalar_lea.sflag [#allocation9], %s282_s11 }
  0xc3   : > { %p373_p8 = pnand %p849_p10, %p848_p7 }
  0xc5   : > { %565 = dma.done.wait (!%p373_p8), %s283_s12, 128  }
  0xc6   : > { %567 = vsyncadd (!%p373_p8), %s283_s12, 4294967168  ;;  %s37_s19 = sadd.s32 1, %s590_s19   ;;  %s850_s3 = smov %s574_s15 }
  0xc7   : > { %p34_p0 = scmp.ge.s32.totalorder %s37_s19, 4   ;;  %s851_s15 = smov %s578_s16 }
  0xc8   : > { %s852_s16 = smov %s705_s28  ;;  %s853_s17 = smov %s586_s18 }
  0xc9   : > { %s854_s18 = smov %s856_s22  ;;  %36 = sbr.rel (!%p34_p0) target bundleno = 49 (0x31), region = 77 }
  0xd0   :  { %288 = vsyncpa [#allocation8], 1 }
  0xd1   :  { %290 = vsyncpa [#allocation8 + $0x1], 1 }
  0xd2   :  { %291 = vsyncpa [#allocation9], 1 }
  0xd3   :  { %293 = vsyncpa [#allocation9 + $0x1], 1 }

</bundles_post_ra>
